<compile_context>
chip_gen: v6e
topology: v6e:2x2x1
jax: 0.10.0
libtpu: 0.0.40
codegen_flags: <defaults>
</compile_context>

<pallas_src>
import functools

import jax
import jax.numpy as jnp
from jax.experimental import pallas as pl
from jax.experimental.pallas import tpu as pltpu


def _ln_leaky_kernel(x_ref, g_ref, b_ref, o_ref, *, eps, negative_slope):
    # x_ref: (TR, D)   g_ref, b_ref: (1, D) f32   o_ref: (TR, D)
    x = x_ref[...].astype(jnp.float32)                          # f32 compute path
    inv_d = 1.0 / x.shape[-1]
    # One-pass statistics: sum(x) and sum(x*x) together, var = E[x^2] - mean^2.
    s1 = jnp.sum(x, axis=-1, keepdims=True)                     # (TR, 1)
    s2 = jnp.sum(x * x, axis=-1, keepdims=True)                 # (TR, 1)
    mean = s1 * inv_d
    var = jnp.maximum(s2 * inv_d - mean * mean, 0.0)
    inv = jax.lax.rsqrt(var + eps)                              # EUP (free slot)
    y = (x - mean) * inv * g_ref[...] + b_ref[...]
    # LeakyReLU, valid for 0 < negative_slope < 1: max(y, slope*y).
    o_ref[...] = jnp.maximum(y, negative_slope * y).astype(o_ref.dtype)


def _xla_fallback(x, gamma, beta, eps, negative_slope):
    xf = x.astype(jnp.float32)
    mean = jnp.mean(xf, axis=-1, keepdims=True)
    var = jnp.mean((xf - mean) ** 2, axis=-1, keepdims=True)
    y = (xf - mean) * jax.lax.rsqrt(var + eps) * gamma.astype(jnp.float32) \
        + beta.astype(jnp.float32)
    return jnp.maximum(y, negative_slope * y).astype(x.dtype)


def combined_norm_activation(x, gamma, beta, *, eps=1e-5, negative_slope=0.01,
                             block_rows=None):
    """Fused LayerNorm(last dim) + LeakyReLU.

    x: (..., D); gamma, beta: (D,). Returns array of the same shape/dtype as x.
    """
    orig_shape = x.shape
    D = orig_shape[-1]
    x2 = x.reshape(-1, D)
    R = x2.shape[0]
    itemsize = jnp.dtype(x.dtype).itemsize

    # Sublane-pack multiple of the I/O dtype: 8 (f32), 16 (bf16), 32 (i8/fp8).
    sub = max(8, 8 * (4 // max(itemsize, 1)))

    # Generation-aware VMEM budget: 75% of physical (v7x: ~48 MiB, v5e/v6e: ~96 MiB).
    try:
        vmem_cap = int(pltpu.get_tpu_info().vmem_capacity_bytes)
    except Exception:
        vmem_cap = 128 * 1024 * 1024
    budget = (3 * vmem_cap) // 4
    headroom = 2 * 1024 * 1024
    # Per-row VMEM cost: in+out tiles double-buffered (4 * itemsize bytes/elem)
    # plus ~3 f32 intermediates (x, x-mean, y) materialized inside the body.
    per_row_bytes = D * (4 * itemsize + 12)

    # Graceful fallback if even the minimum (sub, D) tile can't fit the budget.
    if sub * per_row_bytes + headroom > budget:
        # TODO(synk): a two-pass / column-tiled LayerNorm kernel for huge D.
        return _xla_fallback(x2, gamma, beta, eps, negative_slope).reshape(orig_shape)

    if block_rows is None:
        target_bytes = 8 * 1024 * 1024                  # ~8 MiB of input per tile
        block_rows = target_bytes // max(D * itemsize, 1)
    block_rows = max(sub, (int(block_rows) // sub) * sub)

    # Cap by what fits in the VMEM budget.
    max_rows_vmem = max(sub, ((budget - headroom) // per_row_bytes // sub) * sub)
    block_rows = min(block_rows, max_rows_vmem)

    # Never exceed the (sub-padded) number of rows present.
    r_full = pl.cdiv(R, sub) * sub
    block_rows = min(block_rows, r_full)

    # Ensure >= 2 grid steps so the v7x megacore can shard the row axis.
    if r_full >= 2 * sub:
        half = pl.cdiv(pl.cdiv(R, 2), sub) * sub
        block_rows = min(block_rows, half)
    block_rows = max(sub, block_rows)

    r_pad = pl.cdiv(R, block_rows) * block_rows
    if r_pad != R:
        # Padded rows produce finite garbage (LeakyReLU(beta)) and are sliced off.
        x2 = jnp.pad(x2, ((0, r_pad - R), (0, 0)))

    # Pre-cast params to f32 lane-dense rows: no per-step casts in the kernel.
    g2 = gamma.astype(jnp.float32).reshape(1, D)
    b2 = beta.astype(jnp.float32).reshape(1, D)

    # VMEM limit: actual tile usage (I/O double-buffered + f32 temps) + headroom,
    # clamped to the generation-aware budget.
    est_usage = 4 * block_rows * D * itemsize + 3 * block_rows * D * 4 + headroom
    vmem_limit = int(min(budget, max(16 * 1024 * 1024, est_usage)))

    cost = pl.CostEstimate(
        flops=int(10 * R * D),
        transcendentals=int(R),
        bytes_accessed=int(2 * R * D * itemsize + 2 * D * 4),
    )

    out = pl.pallas_call(
        functools.partial(_ln_leaky_kernel, eps=eps,
                          negative_slope=negative_slope),
        out_shape=jax.ShapeDtypeStruct((r_pad, D), x.dtype),
        grid_spec=pltpu.PrefetchScalarGridSpec(
            num_scalar_prefetch=0,
            grid=(r_pad // block_rows,),
            in_specs=[
                pl.BlockSpec((block_rows, D), lambda r: (r, 0)),
                pl.BlockSpec((1, D), lambda r: (0, 0)),
                pl.BlockSpec((1, D), lambda r: (0, 0)),
            ],
            out_specs=pl.BlockSpec((block_rows, D), lambda r: (r, 0)),
        ),
        compiler_params=pltpu.CompilerParams(
            dimension_semantics=("parallel",),
            vmem_limit_bytes=vmem_limit,
        ),
        cost_estimate=cost,
    )(x2, g2, b2)

    if r_pad != R:
        out = out[:R]
    return out.reshape(orig_shape)


def _reference(x, gamma, beta, eps=1e-5, negative_slope=0.01):
    mean = jnp.mean(x, axis=-1, keepdims=True)
    var = jnp.mean((x - mean) ** 2, axis=-1, keepdims=True)
    y = (x - mean) / jnp.sqrt(var + eps) * gamma + beta
    return jnp.where(y >= 0, y, negative_slope * y)


if __name__ == "__main__":
    # Module default normalized_shape=512; small batch/seq.
    B, L, D = 2, 8, 512
    key = jax.random.PRNGKey(0)
    kx, kg, kb = jax.random.split(key, 3)
    x = jax.random.normal(kx, (B, L, D), dtype=jnp.float32)
    # LayerNorm affine params (PyTorch default init is ones/zeros; randomize a
    # little so the affine path is actually exercised).
    gamma = 1.0 + 0.1 * jax.random.normal(kg, (D,), dtype=jnp.float32)
    beta = 0.1 * jax.random.normal(kb, (D,), dtype=jnp.float32)

    out = combined_norm_activation(x, gamma, beta, eps=1e-5, negative_slope=0.01)
    out = jax.block_until_ready(out)

    ref = _reference(x, gamma, beta, eps=1e-5, negative_slope=0.01)
    assert out.shape == x.shape
    # One-pass variance vs two-pass reference: allow a small numerical slack.
    assert jnp.allclose(out, ref, atol=2e-5, rtol=1e-5), "mismatch vs reference"
    # NOTE: the PyTorch module's dynamic re-creation of LayerNorm when the last
    # dim changes is handled naturally here — gamma/beta are sized per call.
    print("KERNEL_OK")
</pallas_src>

<mosaic_0001>
module attributes {stable_mosaic.version = 11 : i64} {
  func.func @_ln_leaky_kernel(%arg0: i32, %arg1: memref<8x512xf32, #tpu.memory_space<vmem>>, %arg2: memref<1x512xf32, #tpu.memory_space<vmem>>, %arg3: memref<1x512xf32, #tpu.memory_space<vmem>>, %arg4: memref<8x512xf32, #tpu.memory_space<vmem>>) attributes {dimension_semantics = [#tpu.dimension_semantics<parallel>], iteration_bounds = array<i64: 2>, scalar_prefetch = 0 : i64, scratch_operands = 0 : i64, tpu.core_type = #tpu.core_type<tc>, window_params = [{transform_indices = @transform_0, window_bounds = array<i64: 8, 512>}, {pipeline_mode = #tpu.pipeline_mode<synchronous>, transform_indices = @transform_1, window_bounds = array<i64: 1, 512>}, {pipeline_mode = #tpu.pipeline_mode<synchronous>, transform_indices = @transform_2, window_bounds = array<i64: 1, 512>}, {transform_indices = @transform_3, window_bounds = array<i64: 8, 512>}]} {
    %c0 = arith.constant 0 : index
    %c0_0 = arith.constant 0 : index
    %0 = vector.load %arg1[%c0, %c0_0] : memref<8x512xf32, #tpu.memory_space<vmem>>, vector<8x512xf32>
    %cst = arith.constant dense<0.000000e+00> : vector<8xf32>
    %1 = vector.multi_reduction <add>, %0, %cst [1] : vector<8x512xf32> to vector<8xf32>
    %2 = vector.shape_cast %1 : vector<8xf32> to vector<8x1xf32>
    %3 = arith.mulf %0, %0 : vector<8x512xf32>
    %cst_1 = arith.constant dense<0.000000e+00> : vector<8xf32>
    %4 = vector.multi_reduction <add>, %3, %cst_1 [1] : vector<8x512xf32> to vector<8xf32>
    %5 = vector.shape_cast %4 : vector<8xf32> to vector<8x1xf32>
    %cst_2 = arith.constant 0.001953125 : f32
    %6 = vector.broadcast %cst_2 : f32 to vector<8x1xf32>
    %7 = arith.mulf %2, %6 : vector<8x1xf32>
    %cst_3 = arith.constant 0.001953125 : f32
    %8 = vector.broadcast %cst_3 : f32 to vector<8x1xf32>
    %9 = arith.mulf %5, %8 : vector<8x1xf32>
    %10 = arith.mulf %7, %7 : vector<8x1xf32>
    %11 = arith.subf %9, %10 : vector<8x1xf32>
    %cst_4 = arith.constant 0.000000e+00 : f32
    %12 = vector.broadcast %cst_4 : f32 to vector<8x1xf32>
    %13 = arith.maximumf %11, %12 : vector<8x1xf32>
    %cst_5 = arith.constant 9.99999974E-6 : f32
    %14 = vector.broadcast %cst_5 : f32 to vector<8x1xf32>
    %15 = arith.addf %13, %14 : vector<8x1xf32>
    %16 = math.rsqrt %15 : vector<8x1xf32>
    %17 = vector.broadcast %7 : vector<8x1xf32> to vector<8x512xf32>
    %18 = arith.subf %0, %17 : vector<8x512xf32>
    %19 = vector.broadcast %16 : vector<8x1xf32> to vector<8x512xf32>
    %20 = arith.mulf %18, %19 : vector<8x512xf32>
    %c0_6 = arith.constant 0 : index
    %c0_7 = arith.constant 0 : index
    %21 = vector.load %arg2[%c0_6, %c0_7] : memref<1x512xf32, #tpu.memory_space<vmem>>, vector<1x512xf32>
    %22 = vector.broadcast %21 : vector<1x512xf32> to vector<8x512xf32>
    %23 = arith.mulf %20, %22 : vector<8x512xf32>
    %c0_8 = arith.constant 0 : index
    %c0_9 = arith.constant 0 : index
    %24 = vector.load %arg3[%c0_8, %c0_9] : memref<1x512xf32, #tpu.memory_space<vmem>>, vector<1x512xf32>
    %25 = vector.broadcast %24 : vector<1x512xf32> to vector<8x512xf32>
    %26 = arith.addf %23, %25 : vector<8x512xf32>
    %cst_10 = arith.constant 0.00999999977 : f32
    %27 = vector.broadcast %cst_10 : f32 to vector<8x512xf32>
    %28 = arith.mulf %27, %26 : vector<8x512xf32>
    %29 = arith.maximumf %26, %28 : vector<8x512xf32>
    %c0_11 = arith.constant 0 : index
    %c0_12 = arith.constant 0 : index
    %30 = vector.load %arg4[%c0_11, %c0_12] : memref<8x512xf32, #tpu.memory_space<vmem>>, vector<8x512xf32>
    tpu.vector_store %arg4[%c0_11, %c0_12], %29 {strides = array<i32>} : memref<8x512xf32, #tpu.memory_space<vmem>>, vector<8x512xf32>,
    return
  }
  func.func @transform_0(%arg0: i32) -> (i32, i32) {
    %c0_i32 = arith.constant 0 : i32
    %c0_i32_0 = arith.constant 0 : i32
    return %arg0, %c0_i32 : i32, i32
  }
  func.func @transform_1(%arg0: i32) -> (i32, i32) {
    %c0_i32 = arith.constant 0 : i32
    %c0_i32_0 = arith.constant 0 : i32
    %c0_i32_1 = arith.constant 0 : i32
    return %c0_i32, %c0_i32_0 : i32, i32
  }
  func.func @transform_2(%arg0: i32) -> (i32, i32) {
    %c0_i32 = arith.constant 0 : i32
    %c0_i32_0 = arith.constant 0 : i32
    %c0_i32_1 = arith.constant 0 : i32
    return %c0_i32, %c0_i32_0 : i32, i32
  }
  func.func @transform_3(%arg0: i32) -> (i32, i32) {
    %c0_i32 = arith.constant 0 : i32
    %c0_i32_0 = arith.constant 0 : i32
    return %arg0, %c0_i32 : i32, i32
  }
}

</mosaic_0001>

<bundles_post_ra>
// kernel: tpu_custom_call.1
= control target key start
LH: loop header
LB: loop body
LE: loop exit
PB: predicated region body
PF: predicated region fallthrough
CT: control target
= control target key end

     0   :  { %8 = vsyncpa [#allocation3], 0  ;;  %s857_s0 = inlined_call_operand.hbm [shape: f32[16,512], index: 0, kind: input, shape index: {}]   ;;  %s858_s1 = inlined_call_operand.hbm [shape: f32[1,512], index: 1, kind: input, shape index: {}]   ;;  %s859_s2 = inlined_call_operand.hbm [shape: f32[1,512], index: 2, kind: input, shape index: {}]   ;;  %s860_s3 = inlined_call_operand.hbm [shape: f32[16,512], index: 3, kind: output, shape index: {}]  }
   0x1   :  { %10 = vsyncpa [#allocation3 + $0x1], 0 }
   0x2   :  { %11 = vsyncpa [#allocation6], 0 }
   0x3   :  { %12 = vsyncpa [#allocation4], 0 }
   0x4   :  { %14 = vsyncpa [#allocation4 + $0x1], 0  ;;  %s676_s12 = smov 0   ;;  %s678_s13 = smov 0  }
   0x5   :  { %s680_s14 = smov 0   ;;  %s682_s15 = smov 0  }
   0x6 LB: > { %s697_s16 = sadd.s32 4294967295, %s650_s15   ;;  %s413_s17 = sadd.s32 4294967294, %s650_s15   ;;  %s650_s15 = sphi %s682_s15, %s882_s15   ;;  %s646_s14 = sphi %s680_s14, %s881_s14   ;;  %s642_s13 = sphi %s678_s13, %s880_s13   ;;  %s638_s12 = sphi %s676_s12, %s879_s12  }
   0x7   : > { %p40_p0 = scmp.ne.s32.totalorder %s642_s13, %s638_s12  ;;  %p861_p1 = scmp.eq.s32.totalorder %s697_s16, 0 }
   0x8   : > { %p112_p3 = scmp.eq.s32.totalorder %s413_s17, 1  ;;  %p414_p5 = scmp.ge.s32.totalorder %s650_s15, 1 }
   0x9   : > { %p706_p4 = por %p861_p1, %p40_p0  ;;  %p119_p7 = scmp.lt.s32.totalorder %s650_s15, 3 }
   0xa   : > { %p711_p6 = por %p112_p3, %p40_p0  ;;  %s652_s21 = smov [#allocation5]  }
   0xb   : > { %s865_s18 = scalar_select %p706_p4, 1, 0 }
   0xc   : > { %s866_s19 = scalar_select %p711_p6, 1, 0 }
   0xd   : > { %p716_p8 = pnand %p414_p5, %p119_p7  ;;  %s132_s22 = sshll.u32 %s652_s21, 4  ;;  %s133_s22 = int_to_ptr.vmem [resolvable:$true] %s132_s22 }
   0xe   : > { %s653_s23 = smov [#allocation7]   ;;  %s730_s26 = sadd.s32 1, %s650_s15  }
   0xf   : > { %s867_s20 = scalar_select %p716_p8, 1, 0 }
  0x10   : > { %p445_p10 = pneg %p716_p8  ;;  %s143_s24 = sshll.u32 %s653_s23, 4  ;;  %s144_s24 = int_to_ptr.vmem [resolvable:$true] %s143_s24 }
  0x11   : > { %s24_s27 = ssub.s32 %s650_s15, %s730_s26  ;;  %s513_s28 = scalar_lea.vmem %s133_s22, 64 }
  0x12   : > { %p725_p11 = pnand %p445_p10, %p861_p1  ;;  %p514_p13 = scmp.ne.s32.totalorder %s133_s22, %s513_s28 }
  0x13   : > { %p521_p5 = scmp.lt.s32.totalorder %s133_s22, %s133_s22  ;;  %p522_p7 = scmp.lt.s32.totalorder %s513_s28, %s513_s28 }
  0x14   : > { %p504_p12 = pneg %p725_p11 }
  0x15   : > { %p523_p10 = por %p522_p7, %p521_p5 }
  0x16   : > { %p516_p0 = pnand %p514_p13, %p504_p12 }
  0x18   : > { %p517_p3 = pneg %p516_p0 }
  0x1a   : > { %p524_p9 = pnand %p523_p10, %p517_p3 }
  0x1c   : > { %527 = shalt.err (!%p524_p9)
}
  0x1d   : > { %448 = dma.hbm_to_vmem [thread:$0]  (!%p725_p11), %s858_s1, 64, %s133_s22, [#allocation6]  }
  0x1e   : > { %s539_s4 = scalar_lea.vmem %s144_s24, 64  ;;  %p547_p13 = scmp.lt.s32.totalorder %s144_s24, %s144_s24 }
  0x1f   : > { %p540_p1 = scmp.ne.s32.totalorder %s144_s24, %s539_s4  ;;  %p548_p0 = scmp.lt.s32.totalorder %s539_s4, %s539_s4 }
  0x21   : > { %p542_p2 = pnand %p540_p1, %p504_p12  ;;  %p549_p4 = por %p548_p0, %p547_p13 }
  0x23   : > { %p543_p6 = pneg %p542_p2 }
  0x25   : > { %p550_p8 = pnand %p549_p4, %p543_p6 }
  0x27   : > { %553 = shalt.err (!%p550_p8)
}
  0x28   : > { %451 = dma.hbm_to_vmem [thread:$0]  (!%p725_p11), %s859_s2, 64, %s144_s24, [#allocation6]  }
  0x29   : > { %p25_p1 = scmp.eq.s32.totalorder %s24_s27, 0  ;;  %s27_s7 = sadd.s32 1, %s646_s14 }
  0x2a   : > { %p34_p2 = scmp.ne.s32.totalorder %s646_s14, %s642_s13  ;;  %p35_p4 = scmp.eq.s32.totalorder %s650_s15, 0 }
  0x2b   : > { %s757_s8 = scalar_select %p25_p1, %s646_s14, %s27_s7  }
  0x2c   : > { %p36_p6 = por %p35_p4, %p34_p2  ;;  %p869_p8 = scmp.eq.s32.totalorder %s697_s16, 1 }
  0x2d   : > { %p462_p12 = scmp.lt.s32.totalorder %s650_s15, 2  ;;  %s154_s10 = sand.u32 1, %s646_s14  }
  0x2e   : > { %p761_p9 = por %p869_p8, %p34_p2  ;;  %s418_s11 = sshll.u32 %s154_s10, 5 }
  0x2f   : > { %s431_s17 = sshll.u32 %s650_s15, 9  ;;  %s158_s24 = scalar_lea.vmem [#allocation2], %s418_s11 }
  0x30   : > { %s870_s9 = scalar_select %p761_p9, 1, 0 }
  0x31   : > { %s771_s23 = scalar_lea.hbm %s857_s0, %s431_s17  ;;  %s166_s25 = sshll.u32 %s158_s24, 4  ;;  %s167_s25 = int_to_ptr.vmem [resolvable:$true] %s166_s25 }
  0x32   : > { %p773_p11 = pnand %p462_p12, %p36_p6  ;;  %s155_s28 = scalar_lea.sflag [#allocation3], %s154_s10 }
  0x33   : > { %s554_s29 = scalar_lea.hbm %s771_s23, 512  ;;  %s559_s5 = scalar_lea.hbm %s857_s0, 1024 }
  0x34   : > { %p555_p3 = scmp.ne.s32.totalorder %s771_s23, %s554_s29  ;;  %p556_p5 = pneg %p773_p11 }
  0x35   : > { %p560_p13 = scmp.lt.s32.totalorder %s771_s23, %s857_s0  ;;  %p561_p0 = scmp.lt.s32.totalorder %s559_s5, %s554_s29 }
  0x36   : > { %p557_p7 = pnand %p556_p5, %p555_p3 }
  0x37   : > { %p562_p1 = por %p561_p0, %p560_p13 }
  0x38   : > { %p558_p10 = pneg %p557_p7 }
  0x3a   : > { %p563_p2 = pnand %p562_p1, %p558_p10 }
  0x3c   : > { %566 = shalt.err (!%p563_p2)
}
  0x3d   : > { %s567_s11 = scalar_lea.vmem %s167_s25, 512  ;;  %s654_s10 = smov [#allocation2]  }
  0x3e   : > { %p568_p4 = scmp.ne.s32.totalorder %s167_s25, %s567_s11  ;;  %s572_s17 = sshll.u32 %s654_s10, 4  ;;  %s573_s17 = int_to_ptr.vmem [resolvable:$false] %s572_s17 }
  0x3f   : > { %s574_s21 = scalar_lea.vmem %s573_s17, 1024  ;;  %p575_p12 = scmp.lt.s32.totalorder %s167_s25, %s573_s17 }
  0x40   : > { %p570_p6 = pnand %p568_p4, %p556_p5  ;;  %p576_p3 = scmp.lt.s32.totalorder %s574_s21, %s567_s11 }
  0x42   : > { %p571_p8 = pneg %p570_p6  ;;  %p577_p7 = por %p576_p3, %p575_p12 }
  0x44   : > { %p578_p9 = pnand %p577_p7, %p571_p8 }
  0x46   : > { %581 = shalt.err (!%p578_p9)
}
  0x47   : > { %455 = dma.hbm_to_vmem [thread:$0]  (!%p773_p11), %s771_s23, 512, %s167_s25, %s155_s28  }
  0x48   : > { %p872_p10 = scmp.ne.s32.totalorder %s867_s20, 0 }
  0x49   : > { %s794_s22 = sand.u32 (!%p872_p10), 1, %s642_s13   ;;  %p873_p5 = scmp.ne.s32.totalorder (!%p872_p10), %s865_s18, 0 }
  0x4a   : > { %175 = sbr.rel (%p872_p10) target bundleno = 278 (0x116), region = 32  ;;  %s422_s24 = sshll.u32 (!%p872_p10), %s794_s22, 5 }
  0x4b   : > { %s178_s29 = scalar_lea.sflag (!%p872_p10), [#allocation3], %s794_s22  ;;  %s181_s30 = scalar_lea.vmem (!%p872_p10), [#allocation2], %s422_s24 }
  0x4f   : > { %625 = dma.done.wait (%p873_p5), %s178_s29, 512  }
  0x50   : > { %627 = vsyncadd (%p873_p5), %s178_s29, 4294966784  ;;  %p874_p9 = scmp.eq.s32.totalorder %s697_s16, 0 }
  0x52   : > { %629 = dma.done.wait (%p874_p9), [#allocation6], 128   ;;  %p875_p11 = pmov %p874_p9 }
  0x53   : > { %v212_v0 = vld [vmem:[%s181_s30] sm:$0xff]  ;;  %v213_v1 = vld [vmem:[%s181_s30 + $0x8] sm:$0xff]  ;;  %v214_v2 = vld [vmem:[%s181_s30 + $0x10] sm:$0xff]  ;;  %v247_v22 = vlaneseq  ;;  %s432_s18 = sshll.u32 %s697_s16, 9  ;;  %s211_s20 = scalar_lea.vmem [#allocation8], %s422_s24 }
  0x54   : > { %631 = vsyncadd (%p875_p11), [#allocation6], 4294967168  ;;  %v216_v3 = vadd.f32 %v213_v1, %v212_v0  ;;  %v221_v4 = vmul.f32 %v212_v0, %v212_v0  ;;  %v222_v5 = vmul.f32 %v213_v1, %v213_v1  ;;  %v223_v6 = vmul.f32 %v214_v2, %v214_v2  ;;  %v215_v7 = vld [vmem:[%s181_s30 + $0x18] sm:$0xff]  ;;  %v245_v28 = vld [vmem:[#allocation5] sm:$0xf]  ;;  %s324_s23 = sshll.u32 %s211_s20, 4  ;;  %s814_s28 = scalar_lea.hbm %s860_s3, %s432_s18  ;;  %s816_s23 = int_to_ptr.vmem [resolvable:$true] %s324_s23 }
  0x55   : > { %v224_v9 = vmul.f32 %v215_v7, %v215_v7  ;;  %v248_v23 = vshrl.u32 %v247_v22, 7  ;;  %v271_v29 = vld [vmem:[#allocation7] sm:$0xf]  ;;  %s310_s16 = scalar_lea.sflag [#allocation4], %s794_s22  ;;  %s582_s4 = scalar_lea.vmem %s816_s23, 512 }
  0x56   : > { %v217_v8 = vadd.f32 %v216_v3, %v214_v2  ;;  %v225_v10 = vadd.f32 %v222_v5, %v221_v4  ;;  %p583_p13 = scmp.ne.s32.totalorder %s816_s23, %s582_s4  ;;  %p876_p0 = scmp.ne.s32.totalorder %s870_s9, 0 }
  0x57   : > { %v249_v24 = vsub.s32 0, %v248_v23  ;;  %v253_v25 = vsub.s32 1, %v248_v23  ;;  %v257_v26 = vsub.s32 2, %v248_v23  ;;  %v261_v27 = vsub.s32 3, %v248_v23  ;;  %s655_s5 = smov [#allocation8]  }
  0x58   : > { %v218_v11 = vadd.f32 %v217_v8, %v215_v7  ;;  %v226_v12 = vadd.f32 %v225_v10, %v223_v6  ;;  %p584_p1 = pnand %p583_p13, %p876_p0  ;;  %s586_s6 = sshll.u32 %s655_s5, 4  ;;  %s587_s6 = int_to_ptr.vmem [resolvable:$false] %s586_s6 }
  0x59   : > { %v250_v30 = vrot.slane %v245_v28, %v249_v24  ;;  %v254_v31 = vrot.slane %v245_v28, %v253_v25  ;;  %v258_v32 = vrot.slane %v245_v28, %v257_v26  ;;  %v262_v33 = vrot.slane %v245_v28, %v261_v27  ;;  %s588_s7 = scalar_lea.vmem %s587_s6, 1024  ;;  %p589_p4 = scmp.lt.s32.totalorder %s816_s23, %s587_s6 }
  0x5a   : > { %219 = vadd.xlane.f32.xlu0 %v218_v11  ;;  %v227_v13 = vadd.f32 %v226_v12, %v224_v9  ;;  %v276_v39 = vrot.slane %v271_v29, %v249_v24  ;;  %v280_v40 = vrot.slane %v271_v29, %v253_v25  ;;  %v284_v41 = vrot.slane %v271_v29, %v257_v26  ;;  %p585_p2 = pneg %p584_p1  ;;  %p590_p6 = scmp.lt.s32.totalorder %s588_s7, %s582_s4 }
  0x5b   : > { %v288_v42 = vrot.slane %v271_v29, %v261_v27 }
  0x5c   : > { %p591_p8 = por %p590_p6, %p589_p4 }
  0x5e   : > { %228 = vadd.xlane.f32.xlu0 %v227_v13  ;;  %p592_p12 = pnand %p591_p8, %p585_p2 }
  0xe3   : > { %v220_v14 = vpop.xlane.xlu0 %219 }
  0xe4   : > { %v230_v15 = vmul.f32 0.001953125, %v220_v14 }
  0xe6   : > { %v232_v17 = vmul.f32 %v230_v15, %v230_v15  ;;  %v237_v34 = vsub.f32 %v212_v0, %v230_v15  ;;  %v238_v35 = vsub.f32 %v213_v1, %v230_v15  ;;  %v239_v36 = vsub.f32 %v214_v2, %v230_v15 }
  0xe7   : > { %v229_v16 = vpop.xlane.xlu0 %228  ;;  %v240_v37 = vsub.f32 %v215_v7, %v230_v15 }
  0xe8   : > { %v231_v18 = vmul.f32 0.001953125, %v229_v16 }
  0xea   : > { %v233_v19 = vsub.f32 %v231_v18, %v232_v17 }
  0xec   : > { %v234_v20 = vmax.f32 %v233_v19, 0.0 }
  0xee   : > { %v235_v21 = vadd.f32 1e-05, %v234_v20 }
  0xf0   : > { %500 = vrsqrt.f32 %v235_v21 }
  0xfd   : > { %v501_v38 = vpop.eup %500 }
  0xfe   : > { %v241_v43 = vmul.f32 %v501_v38, %v237_v34  ;;  %v242_v44 = vmul.f32 %v501_v38, %v238_v35  ;;  %v243_v45 = vmul.f32 %v501_v38, %v239_v36  ;;  %v244_v46 = vmul.f32 %v501_v38, %v240_v37 }
 0x100   : > { %v267_v47 = vmul.f32 %v250_v30, %v241_v43  ;;  %v268_v48 = vmul.f32 %v254_v31, %v242_v44  ;;  %v269_v49 = vmul.f32 %v258_v32, %v243_v45  ;;  %v270_v50 = vmul.f32 %v262_v33, %v244_v46 }
 0x102   : > { %v293_v51 = vadd.f32 %v276_v39, %v267_v47  ;;  %v294_v52 = vadd.f32 %v280_v40, %v268_v48  ;;  %v295_v53 = vadd.f32 %v284_v41, %v269_v49  ;;  %v296_v54 = vadd.f32 %v288_v42, %v270_v50 }
 0x104   : > { %v297_v55 = vmul.f32 0.01, %v293_v51  ;;  %v298_v56 = vmul.f32 0.01, %v294_v52  ;;  %v299_v57 = vmul.f32 0.01, %v295_v53 }
 0x105   : > { %v300_v58 = vmul.f32 0.01, %v296_v54 }
 0x106   : > { %v301_v59 = vmax.f32 %v293_v51, %v297_v55  ;;  %v302_v60 = vmax.f32 %v294_v52, %v298_v56  ;;  %v303_v61 = vmax.f32 %v295_v53, %v299_v57 }
 0x107   : > { %v304_v62 = vmax.f32 %v296_v54, %v300_v58 }
 0x108   : > { %305 = vst [vmem:[%s211_s20] sm:$0xff] %v301_v59  ;;  %306 = vst [vmem:[%s211_s20 + $0x8] sm:$0xff] %v302_v60 }
 0x109   : > { %307 = vst [vmem:[%s211_s20 + $0x10] sm:$0xff] %v303_v61  ;;  %308 = vst [vmem:[%s211_s20 + $0x18] sm:$0xff] %v304_v62 }
 0x10a   : > { %595 = shalt.err (!%p592_p12)
}
 0x10b   : > { %s596_s11 = scalar_lea.hbm %s814_s28, 512  ;;  %s600_s21 = scalar_lea.hbm %s860_s3, 1024 }
 0x10c   : > { %p597_p3 = scmp.ne.s32.totalorder %s814_s28, %s596_s11  ;;  %p601_p5 = scmp.lt.s32.totalorder %s814_s28, %s860_s3 }
 0x10d   : > { %p602_p9 = scmp.lt.s32.totalorder %s600_s21, %s596_s11 }
 0x10e   : > { %p598_p7 = pnand %p597_p3, %p876_p0 }
 0x10f   : > { %p603_p11 = por %p602_p9, %p601_p5 }
 0x110   : > { %p599_p10 = pneg %p598_p7 }
 0x112   : > { %p604_p13 = pnand %p603_p11, %p599_p10 }
 0x114   : > { %607 = shalt.err (!%p604_p13)
}
 0x115   : > { %443 = dma.vmem_to_hbm [thread:$0]  (%p876_p0), %s816_s23, 512, %s814_s28, %s310_s16  }
 0x116 PF: > { %s336_s29 = sand.u32 1, %s638_s12   ;;  %p877_p1 = scmp.ne.s32.totalorder %s866_s19, 0 }
 0x117   : > { %p878_p2 = scmp.ge.s32.totalorder %s650_s15, 2  ;;  %s337_s30 = scalar_lea.sflag [#allocation4], %s336_s29 }
 0x119   : > { %p457_p4 = pnand %p878_p2, %p877_p1 }
 0x11b   : > { %p458_p6 = pneg %p457_p4 }
 0x11d   : > { %633 = dma.done.wait (%p458_p6), %s337_s30, 512  }
 0x11e   : > { %635 = vsyncadd (%p458_p6), %s337_s30, 4294966784  ;;  %p17_p8 = scmp.ge.s32.totalorder %s730_s26, 4   ;;  %s879_s12 = smov %s642_s13 }
 0x11f   : > { %s880_s13 = smov %s646_s14  ;;  %s881_s14 = smov %s757_s8 }
 0x120   : > { %s882_s15 = smov %s730_s26  ;;  %19 = sbr.rel (!%p17_p8) target bundleno = 6 (0x6), region = 85 }
 0x125   :  { %342 = vsyncpa [#allocation3], 1 }
 0x126   :  { %344 = vsyncpa [#allocation3 + $0x1], 1 }
 0x127   :  { %345 = vsyncpa [#allocation6], 1 }
 0x128   :  { %346 = vsyncpa [#allocation4], 1 }
 0x129   :  { %348 = vsyncpa [#allocation4 + $0x1], 1 }

</bundles_post_ra>
